<compile_context>
chip_gen: v5e
topology: v5e:2x2
jax: 0.10.0
libtpu: 0.0.40
codegen_flags: <defaults>
</compile_context>

<pallas_src>
import functools

import jax
import jax.numpy as jnp
from jax.experimental import pallas as pl
from jax.experimental.pallas import tpu as pltpu


# ----------------------------------------------------------------------------
# Segmentation statistics kernel.
#
# Per grid step (core, b, t) the kernel sees:
#   logits_ref : [C, TILE]  (classes on sublanes, pixels on lanes)
#   labels_ref : [1, TILE]  int32
# Outputs (written once per core, at its last grid step):
#   nll/inter/psum/ysum partials, each [C, 1] per core.
# Accumulator scratch ([C, TILE] each) persists across (b, t) for each core.
# ----------------------------------------------------------------------------
def _seg_stats_kernel(logits_ref, labels_ref,
                      nll_out, inter_out, psum_out, ysum_out,
                      nll_acc, inter_acc, psum_acc, ysum_acc, *, hw):
    core = pl.program_id(0)
    b = pl.program_id(1)
    t = pl.program_id(2)
    nb = pl.num_programs(1)
    nt = pl.num_programs(2)          # tiles handled per core

    @pl.when((b == 0) & (t == 0))
    def _init():
        nll_acc[...] = jnp.zeros_like(nll_acc)
        inter_acc[...] = jnp.zeros_like(inter_acc)
        psum_acc[...] = jnp.zeros_like(psum_acc)
        ysum_acc[...] = jnp.zeros_like(ysum_acc)

    # Upcast per-tile inside the kernel (keeps HBM traffic at the input dtype).
    x = logits_ref[...].astype(jnp.float32)              # [C, T]
    labels = labels_ref[...]                              # [1, T] int32
    C, T = x.shape

    # Global (un-clamped) pixel index for cdiv-grid remainder masking.
    tile_idx = core * nt + t
    pix = tile_idx * T + jax.lax.broadcasted_iota(jnp.int32, (1, T), 1)
    valid_b = pix < hw                                     # [1, T] bool
    valid = valid_b.astype(jnp.float32)

    # Sanitize out-of-range lanes: OOB reads can hold Inf/NaN bit patterns and
    # 0 * inf would otherwise poison the masked accumulations.
    x = jnp.where(valid_b, x, 0.0)

    # One-hot mask built on the fly (no materialized one-hot in HBM).
    cls_iota = jax.lax.broadcasted_iota(jnp.int32, (C, T), 0)
    onehot = (cls_iota == labels).astype(jnp.float32) * valid   # [C, T]

    # Numerically stable softmax / log-softmax over the class (sublane) axis.
    m = jnp.max(x, axis=0, keepdims=True)                  # [1, T]
    ex = jnp.exp(x - m)                                     # [C, T]
    se = jnp.sum(ex, axis=0, keepdims=True)                 # [1, T]
    logp = (x - m) - jnp.log(se)                             # [C, T]
    p = ex * pl.reciprocal(se, approx=True)                  # [C, T] (EUP recip)

    # Pure-VPU elementwise accumulation; cross-lane reduction deferred to finalize.
    nll_acc[...] += onehot * (-logp)
    inter_acc[...] += p * onehot
    psum_acc[...] += p * valid
    ysum_acc[...] += onehot

    @pl.when((b == nb - 1) & (t == nt - 1))
    def _finalize():
        nll_out[...] = jnp.sum(nll_acc[...], axis=1, keepdims=True)    # [C, 1]
        inter_out[...] = jnp.sum(inter_acc[...], axis=1, keepdims=True)
        psum_out[...] = jnp.sum(psum_acc[...], axis=1, keepdims=True)
        ysum_out[...] = jnp.sum(ysum_acc[...], axis=1, keepdims=True)


def _round_up(x, m):
    return ((x + m - 1) // m) * m


def _pick_tile(hw, c, max_tile=16384, vmem_budget=12 << 20):
    """Fixed large lane-tile, capped by an explicit VMEM budget (padded-sublane
    footprint counted), independent of HW's factorization (cdiv grid + masking)."""
    hw_pad = _round_up(hw, 128)
    c_pad = max(8, _round_up(c, 8))
    # bytes per pixel-lane across all resident lane-dense buffers:
    #   logits block x2 (double-buffered) + labels block x2 (pads to 8 sublanes)
    #   + 4 accumulator scratch buffers.
    bytes_per_pix = 4 * (2 * c_pad + 2 * 8 + 4 * c_pad)
    budget_tile = max(128, (vmem_budget // bytes_per_pix) // 128 * 128)
    tile = int(min(max_tile, budget_tile, hw_pad))
    if tile > hw:
        # Only possible for small HW that is not a multiple of 128: use a single
        # full-extent block (exempt from the 128-divisibility rule).
        tile = hw
    return tile


def seg_loss_pallas(logits_nchw, targets_bhw, class_weights):
    """logits_nchw: [B, C, H, W] (f32 or bf16), targets_bhw: [B, H, W] int,
    class_weights: [C].  Returns (weighted CE, soft-Dice, soft-mIoU)."""
    B, C, H, W = logits_nchw.shape
    HW = H * W
    tile = _pick_tile(HW, C)
    n_tiles = pl.cdiv(HW, tile)
    # 2-TC split (v7x megacore); on 1-TC chips the extra axis is a cheap serial
    # loop, so no per-generation gating is required.
    # TODO(synk): query the real per-chip TensorCore count via pltpu.get_tpu_info().
    ncores = min(2, n_tiles)
    tiles_per_core = pl.cdiv(n_tiles, ncores)

    # Free reshapes only - no transpose, no dtype cast in the wrapper.
    logits3d = logits_nchw.reshape(B, C, HW)
    labels3d = targets_bhw.reshape(B, 1, HW).astype(jnp.int32)

    def data_map(c, b, t):
        # Clamp to keep the DMA in bounds; in-kernel masking (built from the
        # UN-clamped index) zeroes any duplicated / padded lanes.
        blk = jnp.minimum(c * tiles_per_core + t, n_tiles - 1)
        return (b, 0, blk)

    part_shape = jax.ShapeDtypeStruct((ncores, C, 1), jnp.float32)
    part_spec = pl.BlockSpec((None, C, 1), lambda c, b, t: (c, 0, 0))

    nll_p, inter_p, psum_p, ysum_p = pl.pallas_call(
        functools.partial(_seg_stats_kernel, hw=HW),
        out_shape=(part_shape, part_shape, part_shape, part_shape),
        grid=(ncores, B, tiles_per_core),
        in_specs=[
            pl.BlockSpec((None, C, tile), data_map),   # logits [C, tile]
            pl.BlockSpec((None, 1, tile), data_map),   # labels [1, tile]
        ],
        out_specs=(part_spec, part_spec, part_spec, part_spec),
        scratch_shapes=[pltpu.VMEM((C, tile), jnp.float32)] * 4,
        compiler_params=pltpu.CompilerParams(
            # Core axis is parallel (megacore split); batch and pixel-tile axes
            # carry the running accumulators -> sequential reduction.
            dimension_semantics=("parallel", "arbitrary", "arbitrary")),
    )(logits3d, labels3d)

    # Tiny finalize math in plain JAX (per-core partial combine + divisions).
    w = class_weights.astype(jnp.float32)                      # [C]
    nll_c = jnp.sum(nll_p[:, :, 0], axis=0)                    # [C]
    inter_c = jnp.sum(inter_p[:, :, 0], axis=0)
    psum_c = jnp.sum(psum_p[:, :, 0], axis=0)
    ysum_c = jnp.sum(ysum_p[:, :, 0], axis=0)

    eps = jnp.float32(1e-5)
    # PyTorch-style weighted CE mean: sum(w[y]*nll) / sum(w[y]).
    ce = jnp.dot(w, nll_c) / jnp.dot(w, ysum_c)
    dice_c = (2.0 * inter_c + eps) / (psum_c + ysum_c + eps)
    iou_c = (inter_c + eps) / (psum_c + ysum_c - inter_c + eps)
    # TODO(synk): reference mIoU implementations often use argmax'd hard
    # predictions / exclude background; this keeps the soft, all-class mean.
    # TODO(synk): add ignore_index masking here if the original CE used one.
    return ce, jnp.mean(dice_c), jnp.mean(iou_c)


# ----------------------------------------------------------------------------
# Classification ("IDH") weighted cross-entropy - plain JAX.
# The input is [B=2, K=2]; a pallas_call here costs more than the compute.
# ----------------------------------------------------------------------------
def cls_loss_jax(logits, targets, class_weights):
    logits = logits.astype(jnp.float32)
    logp = jax.nn.log_softmax(logits, axis=-1)
    nll = -jnp.take_along_axis(logp, targets[:, None], axis=-1)[:, 0]
    wt = class_weights.astype(jnp.float32)[targets]
    return jnp.sum(wt * nll) / jnp.sum(wt)


# ----------------------------------------------------------------------------
# AutomaticWeightedLoss1.forward
# ----------------------------------------------------------------------------
def automatic_weighted_loss1_forward(params, outputs, targets, weights):
    """params: [task_num]=2.  outputs/targets/weights are (seg, idh) pairs."""
    seg_logits, cls_logits = outputs
    seg_tgt, cls_tgt = targets
    seg_w, cls_w = weights

    p0 = params[0]
    p1 = params[1]
    std_1 = jnp.log(1.0 + p0 ** 2)
    std_2 = jnp.log(1.0 + p1 ** 2)

    seg_loss, dice, miou = seg_loss_pallas(seg_logits, seg_tgt, seg_w)
    # torch.sum(..., -1) over a 0-d loss is the identity; losses are scalars.
    seg_loss_1 = 0.5 / (p0 ** 2) * seg_loss + std_1

    idh_loss = cls_loss_jax(cls_logits, cls_tgt, cls_w)
    idh_loss_1 = 0.5 / (p1 ** 2) * idh_loss + std_2

    loss = seg_loss_1 + idh_loss_1
    return loss, seg_loss, idh_loss, dice, miou, std_1, std_2


if __name__ == "__main__":
    key = jax.random.PRNGKey(0)
    k1, k2, k3, k4 = jax.random.split(key, 4)

    # task 0: segmentation - NCHW logits, per-pixel integer labels, per-class weights
    B, C, H, W = 2, 4, 16, 16
    seg_logits = jax.random.normal(k1, (B, C, H, W), dtype=jnp.float32)
    seg_targets = jax.random.randint(k2, (B, H, W), 0, C, dtype=jnp.int32)
    seg_weights = jnp.array([0.5, 1.0, 1.5, 2.0], dtype=jnp.float32)

    # task 1: IDH classification - [B, K] logits, integer labels, per-class weights
    K = 2
    cls_logits = jax.random.normal(k3, (B, K), dtype=jnp.float32)
    cls_targets = jax.random.randint(k4, (B,), 0, K, dtype=jnp.int32)
    cls_weights = jnp.array([1.0, 2.0], dtype=jnp.float32)

    # deterministic parameter init, mirroring nn.Parameter(torch.ones(task_num))
    params = jnp.ones((2,), dtype=jnp.float32)

    result = automatic_weighted_loss1_forward(
        params,
        (seg_logits, cls_logits),
        (seg_targets, cls_targets),
        (seg_weights, cls_weights),
    )
    jax.block_until_ready(result)
    print("KERNEL_OK")
</pallas_src>

<mosaic_0001>
module attributes {stable_mosaic.version = 11 : i64} {
  func.func @_seg_stats_kernel(%arg0: i32, %arg1: i32, %arg2: i32, %arg3: memref<1x4x256xf32, #tpu.memory_space<vmem>>, %arg4: memref<1x1x256xi32, #tpu.memory_space<vmem>>, %arg5: memref<1x4x1xf32, #tpu.memory_space<vmem>>, %arg6: memref<1x4x1xf32, #tpu.memory_space<vmem>>, %arg7: memref<1x4x1xf32, #tpu.memory_space<vmem>>, %arg8: memref<1x4x1xf32, #tpu.memory_space<vmem>>, %arg9: memref<4x256xf32, #tpu.memory_space<vmem>>, %arg10: memref<4x256xf32, #tpu.memory_space<vmem>>, %arg11: memref<4x256xf32, #tpu.memory_space<vmem>>, %arg12: memref<4x256xf32, #tpu.memory_space<vmem>>) attributes {dimension_semantics = [#tpu.dimension_semantics<parallel>, #tpu.dimension_semantics<arbitrary>, #tpu.dimension_semantics<arbitrary>], iteration_bounds = array<i64: 1, 2, 1>, scalar_prefetch = 0 : i64, scratch_operands = 4 : i64, tpu.core_type = #tpu.core_type<tc>, window_params = [{transform_indices = @transform_0, window_bounds = array<i64: 1, 4, 256>}, {transform_indices = @transform_1, window_bounds = array<i64: 1, 1, 256>}, {transform_indices = @transform_2, window_bounds = array<i64: 1, 4, 1>}, {transform_indices = @transform_3, window_bounds = array<i64: 1, 4, 1>}, {transform_indices = @transform_4, window_bounds = array<i64: 1, 4, 1>}, {transform_indices = @transform_5, window_bounds = array<i64: 1, 4, 1>}]} {
    %c0_i32 = arith.constant 0 : i32
    %0 = arith.cmpi eq, %arg1, %c0_i32 : i32
    %c0_i32_0 = arith.constant 0 : i32
    %1 = arith.cmpi eq, %arg2, %c0_i32_0 : i32
    %2 = arith.andi %0, %1 : i1
    %3 = arith.extui %2 : i1 to i32
    %c0_i32_1 = arith.constant 0 : i32
    %4 = arith.cmpi ne, %3, %c0_i32_1 : i32
    scf.if %4 {
      %cst_30 = arith.constant 0.000000e+00 : f32
      %68 = vector.broadcast %cst_30 : f32 to vector<4x256xf32>
      %c0_31 = arith.constant 0 : index
      %c0_32 = arith.constant 0 : index
      %69 = vector.load %arg9[%c0_31, %c0_32] : memref<4x256xf32, #tpu.memory_space<vmem>>, vector<4x256xf32>
      tpu.vector_store %arg9[%c0_31, %c0_32], %68 {strides = array<i32>} : memref<4x256xf32, #tpu.memory_space<vmem>>, vector<4x256xf32>,
      %cst_33 = arith.constant 0.000000e+00 : f32
      %70 = vector.broadcast %cst_33 : f32 to vector<4x256xf32>
      %c0_34 = arith.constant 0 : index
      %c0_35 = arith.constant 0 : index
      %71 = vector.load %arg10[%c0_34, %c0_35] : memref<4x256xf32, #tpu.memory_space<vmem>>, vector<4x256xf32>
      tpu.vector_store %arg10[%c0_34, %c0_35], %70 {strides = array<i32>} : memref<4x256xf32, #tpu.memory_space<vmem>>, vector<4x256xf32>,
      %cst_36 = arith.constant 0.000000e+00 : f32
      %72 = vector.broadcast %cst_36 : f32 to vector<4x256xf32>
      %c0_37 = arith.constant 0 : index
      %c0_38 = arith.constant 0 : index
      %73 = vector.load %arg11[%c0_37, %c0_38] : memref<4x256xf32, #tpu.memory_space<vmem>>, vector<4x256xf32>
      tpu.vector_store %arg11[%c0_37, %c0_38], %72 {strides = array<i32>} : memref<4x256xf32, #tpu.memory_space<vmem>>, vector<4x256xf32>,
      %cst_39 = arith.constant 0.000000e+00 : f32
      %74 = vector.broadcast %cst_39 : f32 to vector<4x256xf32>
      %c0_40 = arith.constant 0 : index
      %c0_41 = arith.constant 0 : index
      %75 = vector.load %arg12[%c0_40, %c0_41] : memref<4x256xf32, #tpu.memory_space<vmem>>, vector<4x256xf32>
      tpu.vector_store %arg12[%c0_40, %c0_41], %74 {strides = array<i32>} : memref<4x256xf32, #tpu.memory_space<vmem>>, vector<4x256xf32>,
    } else {
    }
    %c0 = arith.constant 0 : index
    %c0_2 = arith.constant 0 : index
    %c0_3 = arith.constant 0 : index
    %5 = vector.load %arg3[%c0, %c0_2, %c0_3] : memref<1x4x256xf32, #tpu.memory_space<vmem>>, vector<1x4x256xf32>
    %6 = vector.shape_cast %5 : vector<1x4x256xf32> to vector<4x256xf32>
    %c0_4 = arith.constant 0 : index
    %c0_5 = arith.constant 0 : index
    %c0_6 = arith.constant 0 : index
    %7 = vector.load %arg4[%c0_4, %c0_5, %c0_6] : memref<1x1x256xi32, #tpu.memory_space<vmem>>, vector<1x1x256xi32>
    %8 = vector.shape_cast %7 : vector<1x1x256xi32> to vector<1x256xi32>
    %c1_i32 = arith.constant 1 : i32
    %9 = arith.muli %arg0, %c1_i32 : i32
    %10 = arith.addi %9, %arg2 : i32
    %c256_i32 = arith.constant 256 : i32
    %11 = arith.muli %10, %c256_i32 : i32
    %12 = tpu.iota {dimensions = array<i32: 1>} : vector<1x256xi32>
    %13 = vector.broadcast %11 : i32 to vector<1x256xi32>
    %14 = arith.addi %13, %12 : vector<1x256xi32>
    %c256_i32_7 = arith.constant 256 : i32
    %15 = vector.broadcast %c256_i32_7 : i32 to vector<1x256xi32>
    %16 = arith.cmpi slt, %14, %15 : vector<1x256xi32>
    %17 = arith.extui %16 : vector<1x256xi1> to vector<1x256xi32>
    %18 = arith.sitofp %17 : vector<1x256xi32> to vector<1x256xf32>
    %cst = arith.constant 0.000000e+00 : f32
    %19 = vector.shape_cast %16 : vector<1x256xi1> to vector<1x256xi1>
    %20 = vector.broadcast %19 : vector<1x256xi1> to vector<4x256xi1>
    %21 = vector.broadcast %cst : f32 to vector<4x256xf32>
    %22 = arith.select %20, %6, %21 : vector<4x256xi1>, vector<4x256xf32>
    %23 = tpu.iota {dimensions = array<i32: 0>} : vector<4x256xi32>
    %24 = vector.broadcast %8 : vector<1x256xi32> to vector<4x256xi32>
    %25 = arith.cmpi eq, %23, %24 : vector<4x256xi32>
    %26 = arith.extui %25 : vector<4x256xi1> to vector<4x256xi32>
    %27 = arith.sitofp %26 : vector<4x256xi32> to vector<4x256xf32>
    %28 = vector.broadcast %18 : vector<1x256xf32> to vector<4x256xf32>
    %29 = arith.mulf %27, %28 : vector<4x256xf32>
    %cst_8 = arith.constant dense<0xFF800000> : vector<256xf32>
    %30 = vector.multi_reduction <maximumf>, %22, %cst_8 [0] : vector<4x256xf32> to vector<256xf32>
    %31 = vector.shape_cast %30 : vector<256xf32> to vector<1x256xf32>
    %32 = vector.broadcast %31 : vector<1x256xf32> to vector<4x256xf32>
    %33 = arith.subf %22, %32 : vector<4x256xf32>
    %34 = math.exp %33 : vector<4x256xf32>
    %cst_9 = arith.constant dense<0.000000e+00> : vector<256xf32>
    %35 = vector.multi_reduction <add>, %34, %cst_9 [0] : vector<4x256xf32> to vector<256xf32>
    %36 = vector.shape_cast %35 : vector<256xf32> to vector<1x256xf32>
    %37 = vector.broadcast %31 : vector<1x256xf32> to vector<4x256xf32>
    %38 = arith.subf %22, %37 : vector<4x256xf32>
    %39 = math.log %36 : vector<1x256xf32>
    %40 = vector.broadcast %39 : vector<1x256xf32> to vector<4x256xf32>
    %41 = arith.subf %38, %40 : vector<4x256xf32>
    %42 = tpu.reciprocal %36 {approx = true} : vector<1x256xf32> -> vector<1x256xf32>
    %43 = vector.broadcast %42 : vector<1x256xf32> to vector<4x256xf32>
    %44 = arith.mulf %34, %43 : vector<4x256xf32>
    %c0_10 = arith.constant 0 : index
    %c0_11 = arith.constant 0 : index
    %45 = vector.load %arg9[%c0_10, %c0_11] : memref<4x256xf32, #tpu.memory_space<vmem>>, vector<4x256xf32>
    %cst_12 = arith.constant 0.000000e+00 : f32
    %46 = vector.broadcast %cst_12 : f32 to vector<4x256xf32>
    %47 = arith.subf %46, %41 : vector<4x256xf32>
    %48 = arith.mulf %29, %47 : vector<4x256xf32>
    %49 = arith.addf %45, %48 : vector<4x256xf32>
    %c0_13 = arith.constant 0 : index
    %c0_14 = arith.constant 0 : index
    %50 = vector.load %arg9[%c0_13, %c0_14] : memref<4x256xf32, #tpu.memory_space<vmem>>, vector<4x256xf32>
    tpu.vector_store %arg9[%c0_13, %c0_14], %49 {strides = array<i32>} : memref<4x256xf32, #tpu.memory_space<vmem>>, vector<4x256xf32>,
    %c0_15 = arith.constant 0 : index
    %c0_16 = arith.constant 0 : index
    %51 = vector.load %arg10[%c0_15, %c0_16] : memref<4x256xf32, #tpu.memory_space<vmem>>, vector<4x256xf32>
    %52 = arith.mulf %44, %29 : vector<4x256xf32>
    %53 = arith.addf %51, %52 : vector<4x256xf32>
    %c0_17 = arith.constant 0 : index
    %c0_18 = arith.constant 0 : index
    %54 = vector.load %arg10[%c0_17, %c0_18] : memref<4x256xf32, #tpu.memory_space<vmem>>, vector<4x256xf32>
    tpu.vector_store %arg10[%c0_17, %c0_18], %53 {strides = array<i32>} : memref<4x256xf32, #tpu.memory_space<vmem>>, vector<4x256xf32>,
    %c0_19 = arith.constant 0 : index
    %c0_20 = arith.constant 0 : index
    %55 = vector.load %arg11[%c0_19, %c0_20] : memref<4x256xf32, #tpu.memory_space<vmem>>, vector<4x256xf32>
    %56 = vector.broadcast %18 : vector<1x256xf32> to vector<4x256xf32>
    %57 = arith.mulf %44, %56 : vector<4x256xf32>
    %58 = arith.addf %55, %57 : vector<4x256xf32>
    %c0_21 = arith.constant 0 : index
    %c0_22 = arith.constant 0 : index
    %59 = vector.load %arg11[%c0_21, %c0_22] : memref<4x256xf32, #tpu.memory_space<vmem>>, vector<4x256xf32>
    tpu.vector_store %arg11[%c0_21, %c0_22], %58 {strides = array<i32>} : memref<4x256xf32, #tpu.memory_space<vmem>>, vector<4x256xf32>,
    %c0_23 = arith.constant 0 : index
    %c0_24 = arith.constant 0 : index
    %60 = vector.load %arg12[%c0_23, %c0_24] : memref<4x256xf32, #tpu.memory_space<vmem>>, vector<4x256xf32>
    %61 = arith.addf %60, %29 : vector<4x256xf32>
    %c0_25 = arith.constant 0 : index
    %c0_26 = arith.constant 0 : index
    %62 = vector.load %arg12[%c0_25, %c0_26] : memref<4x256xf32, #tpu.memory_space<vmem>>, vector<4x256xf32>
    tpu.vector_store %arg12[%c0_25, %c0_26], %61 {strides = array<i32>} : memref<4x256xf32, #tpu.memory_space<vmem>>, vector<4x256xf32>,
    %c1_i32_27 = arith.constant 1 : i32
    %63 = arith.cmpi eq, %arg1, %c1_i32_27 : i32
    %c0_i32_28 = arith.constant 0 : i32
    %64 = arith.cmpi eq, %arg2, %c0_i32_28 : i32
    %65 = arith.andi %63, %64 : i1
    %66 = arith.extui %65 : i1 to i32
    %c0_i32_29 = arith.constant 0 : i32
    %67 = arith.cmpi ne, %66, %c0_i32_29 : i32
    scf.if %67 {
      %c0_30 = arith.constant 0 : index
      %c0_31 = arith.constant 0 : index
      %68 = vector.load %arg9[%c0_30, %c0_31] : memref<4x256xf32, #tpu.memory_space<vmem>>, vector<4x256xf32>
      %cst_32 = arith.constant dense<0.000000e+00> : vector<4xf32>
      %69 = vector.multi_reduction <add>, %68, %cst_32 [1] : vector<4x256xf32> to vector<4xf32>
      %70 = vector.shape_cast %69 : vector<4xf32> to vector<4x1xf32>
      %c0_33 = arith.constant 0 : index
      %c0_34 = arith.constant 0 : index
      %c0_35 = arith.constant 0 : index
      %71 = vector.load %arg5[%c0_33, %c0_34, %c0_35] : memref<1x4x1xf32, #tpu.memory_space<vmem>>, vector<1x4x1xf32>
      %72 = vector.shape_cast %71 : vector<1x4x1xf32> to vector<4x1xf32>
      %73 = vector.shape_cast %70 : vector<4x1xf32> to vector<1x4x1xf32>
      tpu.vector_store %arg5[%c0_33, %c0_34, %c0_35], %73 {strides = array<i32>} : memref<1x4x1xf32, #tpu.memory_space<vmem>>, vector<1x4x1xf32>,
      %c0_36 = arith.constant 0 : index
      %c0_37 = arith.constant 0 : index
      %74 = vector.load %arg10[%c0_36, %c0_37] : memref<4x256xf32, #tpu.memory_space<vmem>>, vector<4x256xf32>
      %cst_38 = arith.constant dense<0.000000e+00> : vector<4xf32>
      %75 = vector.multi_reduction <add>, %74, %cst_38 [1] : vector<4x256xf32> to vector<4xf32>
      %76 = vector.shape_cast %75 : vector<4xf32> to vector<4x1xf32>
      %c0_39 = arith.constant 0 : index
      %c0_40 = arith.constant 0 : index
      %c0_41 = arith.constant 0 : index
      %77 = vector.load %arg6[%c0_39, %c0_40, %c0_41] : memref<1x4x1xf32, #tpu.memory_space<vmem>>, vector<1x4x1xf32>
      %78 = vector.shape_cast %77 : vector<1x4x1xf32> to vector<4x1xf32>
      %79 = vector.shape_cast %76 : vector<4x1xf32> to vector<1x4x1xf32>
      tpu.vector_store %arg6[%c0_39, %c0_40, %c0_41], %79 {strides = array<i32>} : memref<1x4x1xf32, #tpu.memory_space<vmem>>, vector<1x4x1xf32>,
      %c0_42 = arith.constant 0 : index
      %c0_43 = arith.constant 0 : index
      %80 = vector.load %arg11[%c0_42, %c0_43] : memref<4x256xf32, #tpu.memory_space<vmem>>, vector<4x256xf32>
      %cst_44 = arith.constant dense<0.000000e+00> : vector<4xf32>
      %81 = vector.multi_reduction <add>, %80, %cst_44 [1] : vector<4x256xf32> to vector<4xf32>
      %82 = vector.shape_cast %81 : vector<4xf32> to vector<4x1xf32>
      %c0_45 = arith.constant 0 : index
      %c0_46 = arith.constant 0 : index
      %c0_47 = arith.constant 0 : index
      %83 = vector.load %arg7[%c0_45, %c0_46, %c0_47] : memref<1x4x1xf32, #tpu.memory_space<vmem>>, vector<1x4x1xf32>
      %84 = vector.shape_cast %83 : vector<1x4x1xf32> to vector<4x1xf32>
      %85 = vector.shape_cast %82 : vector<4x1xf32> to vector<1x4x1xf32>
      tpu.vector_store %arg7[%c0_45, %c0_46, %c0_47], %85 {strides = array<i32>} : memref<1x4x1xf32, #tpu.memory_space<vmem>>, vector<1x4x1xf32>,
      %c0_48 = arith.constant 0 : index
      %c0_49 = arith.constant 0 : index
      %86 = vector.load %arg12[%c0_48, %c0_49] : memref<4x256xf32, #tpu.memory_space<vmem>>, vector<4x256xf32>
      %cst_50 = arith.constant dense<0.000000e+00> : vector<4xf32>
      %87 = vector.multi_reduction <add>, %86, %cst_50 [1] : vector<4x256xf32> to vector<4xf32>
      %88 = vector.shape_cast %87 : vector<4xf32> to vector<4x1xf32>
      %c0_51 = arith.constant 0 : index
      %c0_52 = arith.constant 0 : index
      %c0_53 = arith.constant 0 : index
      %89 = vector.load %arg8[%c0_51, %c0_52, %c0_53] : memref<1x4x1xf32, #tpu.memory_space<vmem>>, vector<1x4x1xf32>
      %90 = vector.shape_cast %89 : vector<1x4x1xf32> to vector<4x1xf32>
      %91 = vector.shape_cast %88 : vector<4x1xf32> to vector<1x4x1xf32>
      tpu.vector_store %arg8[%c0_51, %c0_52, %c0_53], %91 {strides = array<i32>} : memref<1x4x1xf32, #tpu.memory_space<vmem>>, vector<1x4x1xf32>,
    } else {
    }
    return
  }
  func.func @transform_0(%arg0: i32, %arg1: i32, %arg2: i32) -> (i32, i32, i32) {
    %c1_i32 = arith.constant 1 : i32
    %0 = arith.muli %arg0, %c1_i32 : i32
    %1 = arith.addi %0, %arg2 : i32
    %c0_i32 = arith.constant 0 : i32
    %2 = arith.minsi %1, %c0_i32 : i32
    %c0_i32_0 = arith.constant 0 : i32
    %c0_i32_1 = arith.constant 0 : i32
    return %arg1, %c0_i32_0, %2 : i32, i32, i32
  }
  func.func @transform_1(%arg0: i32, %arg1: i32, %arg2: i32) -> (i32, i32, i32) {
    %c1_i32 = arith.constant 1 : i32
    %0 = arith.muli %arg0, %c1_i32 : i32
    %1 = arith.addi %0, %arg2 : i32
    %c0_i32 = arith.constant 0 : i32
    %2 = arith.minsi %1, %c0_i32 : i32
    %c0_i32_0 = arith.constant 0 : i32
    %c0_i32_1 = arith.constant 0 : i32
    return %arg1, %c0_i32_0, %2 : i32, i32, i32
  }
  func.func @transform_2(%arg0: i32, %arg1: i32, %arg2: i32) -> (i32, i32, i32) {
    %c0_i32 = arith.constant 0 : i32
    %c0_i32_0 = arith.constant 0 : i32
    %c0_i32_1 = arith.constant 0 : i32
    return %arg0, %c0_i32, %c0_i32_0 : i32, i32, i32
  }
  func.func @transform_3(%arg0: i32, %arg1: i32, %arg2: i32) -> (i32, i32, i32) {
    %c0_i32 = arith.constant 0 : i32
    %c0_i32_0 = arith.constant 0 : i32
    %c0_i32_1 = arith.constant 0 : i32
    return %arg0, %c0_i32, %c0_i32_0 : i32, i32, i32
  }
  func.func @transform_4(%arg0: i32, %arg1: i32, %arg2: i32) -> (i32, i32, i32) {
    %c0_i32 = arith.constant 0 : i32
    %c0_i32_0 = arith.constant 0 : i32
    %c0_i32_1 = arith.constant 0 : i32
    return %arg0, %c0_i32, %c0_i32_0 : i32, i32, i32
  }
  func.func @transform_5(%arg0: i32, %arg1: i32, %arg2: i32) -> (i32, i32, i32) {
    %c0_i32 = arith.constant 0 : i32
    %c0_i32_0 = arith.constant 0 : i32
    %c0_i32_1 = arith.constant 0 : i32
    return %arg0, %c0_i32, %c0_i32_0 : i32, i32, i32
  }
}

</mosaic_0001>

<bundles_post_ra>
// kernel: tpu_custom_call.1
= control target key start
LH: loop header
LB: loop body
LE: loop exit
PB: predicated region body
PF: predicated region fallthrough
CT: control target
= control target key end

     0   :  { %11 = vsyncpa [#allocation7], 0  ;;  %s1122_s0 = inlined_call_operand.hbm [shape: f32[2,4,256], index: 0, kind: input, shape index: {}]   ;;  %s1123_s1 = inlined_call_operand.hbm [shape: s32[2,1,256], index: 1, kind: input, shape index: {}]   ;;  %s1124_s2 = inlined_call_operand.vmem [shape: f32[1,4,1], index: 2, kind: output, shape index: {0}]   ;;  %s1125_s3 = inlined_call_operand.vmem [shape: f32[1,4,1], index: 3, kind: output, shape index: {1}]   ;;  %s1126_s4 = inlined_call_operand.vmem [shape: f32[1,4,1], index: 4, kind: output, shape index: {2}]   ;;  %s1127_s5 = inlined_call_operand.vmem [shape: f32[1,4,1], index: 5, kind: output, shape index: {3}]  }
   0x1   :  { %13 = vsyncpa [#allocation7 + $0x1], 0 }
   0x2   :  { %14 = vsyncpa [#allocation9], 0 }
   0x3   :  { %16 = vsyncpa [#allocation9 + $0x1], 0  ;;  %s988_s18 = smov 0   ;;  %s990_s19 = smov 0  }
   0x4   :  { %s992_s20 = smov 0   ;;  %s994_s21 = smov 0  }
   0x5   :  { %s996_s22 = smov 0   ;;  %s998_s23 = smov 0  }
   0x6 LB: > { %s742_s24 = sadd.s32 4294967295, %s954_s23   ;;  %s37_s25 = sadd.s32 1, %s950_s22  ;;  %s954_s23 = sphi %s998_s23, %s22_s23   ;;  %s950_s22 = sphi %s996_s22, %s1135_s22   ;;  %s946_s21 = sphi %s994_s21, %s1134_s21   ;;  %s942_s20 = sphi %s992_s20, %s1133_s20   ;;  %s938_s19 = sphi %s990_s19, %s1132_s19   ;;  %s934_s18 = sphi %s988_s18, %s1131_s18  }
   0x7   : > { %p39_p0 = scmp.ge.s32.totalorder %s37_s25, 2  ;;  %s56_s26 = sadd.s32 1, %s942_s20 }
   0x8   : > { %p63_p1 = scmp.ne.s32.totalorder %s942_s20, %s938_s19  ;;  %p64_p2 = scmp.eq.s32.totalorder %s954_s23, 0 }
   0x9   : > { %s1137_s25 = smov (%p39_p0, %s37_s25), 0  ;;  %p69_p4 = scmp.ne.s32.totalorder %s938_s19, %s934_s18 }
   0xa   : > { %p1024_p3 = por %p64_p2, %p63_p1  ;;  %s51_s28 = ssub.s32 %s950_s22, %s1137_s25 }
   0xb   : > { %p70_p5 = scmp.eq.s32.totalorder %s742_s24, 0  ;;  %p54_p6 = scmp.eq.s32.totalorder %s51_s28, 0 }
   0xc   : > { %p777_p8 = scmp.lt.s32.totalorder %s954_s23, 2  ;;  %s231_s6 = sand.u32 1, %s942_s20  }
   0xd   : > { %p1031_p7 = por %p70_p5, %p69_p4  ;;  %s763_s7 = sshll.u32 %s950_s22, 3 }
   0xe   : > { %s1037_s30 = scalar_select %p54_p6, %s942_s20, %s56_s26  }
   0xf   : > { %s745_s8 = sshll.u32 %s231_s6, 3  ;;  %s245_s11 = scalar_lea.hbm %s1122_s0, %s763_s7 }
  0x10   : > { %s247_s12 = sshll.u32 %s245_s11, 4  ;;  %s235_s13 = scalar_lea.vmem [#allocation6], %s745_s8  ;;  %s248_s12 = int_to_ptr.hbm [resolvable:$true] %s247_s12 }
  0x11   : > { %s249_s14 = sshll.u32 %s235_s13, 4  ;;  %p1046_p9 = pnand %p777_p8, %p1024_p3  ;;  %s250_s14 = int_to_ptr.vmem [resolvable:$true] %s249_s14 }
  0x12   : > { %p750_p10 = scmp.ge.s32.totalorder %s954_s23, 1  ;;  %p278_p11 = scmp.lt.s32.totalorder %s954_s23, 3 }
  0x13   : > { %s748_s16 = sshll.u32 %s231_s6, 1  ;;  %s232_s17 = scalar_lea.sflag [#allocation7], %s231_s6 }
  0x14   : > { %773 = dma.hbm_to_vmem [thread:$0]  (!%p1046_p9), %s248_s12, 128, %s250_s14, %s232_s17  }
  0x15   : > { %p279_p12 = pnand %p750_p10, %p278_p11  ;;  %s749_s18 = sshll.u32 %s950_s22, 1 }
  0x16   : > { %s260_s24 = scalar_lea.vmem [#allocation8], %s748_s16  ;;  %s269_s27 = scalar_lea.hbm %s1123_s1, %s749_s18 }
  0x17   : > { %s273_s26 = sshll.u32 %s260_s24, 4  ;;  %s271_s8 = sshll.u32 %s269_s27, 4  ;;  %s274_s26 = int_to_ptr.vmem [resolvable:$true] %s273_s26  ;;  %s272_s8 = int_to_ptr.hbm [resolvable:$true] %s271_s8 }
  0x18   : > { %s257_s9 = scalar_lea.sflag [#allocation9], %s231_s6  ;;  %282 = sbr.rel (%p279_p12) target bundleno = 269 (0x10d), region = 28 }
  0x19   : > { %776 = dma.hbm_to_vmem [thread:$0]  (!%p1046_p9), %s272_s8, 32, %s274_s26, %s257_s9  }
  0x1a   : > { %s284_s10 = sand.u32 (!%p279_p12), 1, %s938_s19  }
  0x1b   : > { %s751_s11 = sshll.u32 (!%p279_p12), %s284_s10, 3  ;;  %s285_s12 = scalar_lea.sflag (!%p279_p12), [#allocation7], %s284_s10 }
  0x1c   : > { %s288_s13 = scalar_lea.vmem (!%p279_p12), [#allocation6], %s751_s11 }
  0x1d   : > { %925 = dma.done.wait (%p1031_p7), %s285_s12, 128  }
  0x1e   : > { %927 = vsyncadd (%p1031_p7), %s285_s12, 4294967168  ;;  %s752_s14 = sshll.u32 %s284_s10, 1  ;;  %s295_s16 = scalar_lea.sflag [#allocation9], %s284_s10 }
  0x1f   : > { %s1065_s17 = scalar_lea.vmem [#allocation8], %s752_s14 }
  0x20   : > { %929 = dma.done.wait (%p1031_p7), %s295_s16, 32  }
  0x21   : > { %931 = vsyncadd (%p1031_p7), %s295_s16, 4294967264  ;;  %p366_p13 = scmp.eq.s32.totalorder %s946_s21, 0 }
  0x22   : > { %v956_v0 = vmov (%p366_p13), 0.0  }
  0x23   : > { %371 = sbr.rel (!%p366_p13) target bundleno = 40 (0x28), region = 40  ;;  %372 = vst [vmem:[#allocation2] sm:$0xff] (%p366_p13), %v956_v0 }
  0x24   : > { %373 = vst [vmem:[#allocation3] sm:$0xff] (%p366_p13), %v956_v0 }
  0x25   : > { %374 = vst [vmem:[#allocation4] sm:$0xff] (%p366_p13), %v956_v0 }
  0x26   : > { %375 = vst [vmem:[#allocation5] sm:$0xff] (%p366_p13), %v956_v0 }
  0x28 PF: > { %v376_v1 = vld [vmem:[%s288_s13] sm:$0xff]  ;;  %p499_p0 = scmp.eq.s32.totalorder %s946_s21, 1  ;;  %vm414_vm0 = vcmask 1043456   ;;  %v402_v18 = vlaneseq  ;;  %v377_v19 = vld [vmem:[%s1065_s17] sm:$0x3]  ;;  %v957_v27 = vmov 0.0  }
  0x29   : > { %395 = vst [vmem:[#allocation1] ss:$2 sm:$0xff] %v376_v1  ;;  %v405_v25 = vperm.slane %v377_v19, 1  ;;  %v404_v26 = vperm.slane %v377_v19, 0  ;;  %vm516_vm3 = vcmask (%p499_p0), 3072  }
  0x2a   : > { %v403_v24 = vshrl.u32 %v402_v18, 7 }
  0x2b   : > { %v471_v63 = vld [vmem:[#allocation3] sm:$0xff] }
  0x2c   : > { %vm407_vm1 = vcmp.eq.s32.totalorder %v403_v24, %v405_v25  ;;  %vm406_vm2 = vcmp.eq.s32.totalorder %v403_v24, %v404_v26  ;;  %v481_v57 = vld [vmem:[#allocation4] sm:$0xff] }
  0x2d   : > { %v755_v28 = vsel %vm407_vm1, 1.0, %v957_v27  ;;  %v754_v33 = vsel %vm406_vm2, 1.0, %v957_v27  ;;  %v491_v36 = vld [vmem:[#allocation5] sm:$0xff] }
  0x2e   : > { %v494_v30 = vrot.slane %v755_v28, 4 }
  0x30   : > { %v396_v2 = vld.sshfl [vmem:[#allocation1] sm:$0xff pattern:$0x75316420]  ;;  %v397_v3 = vld.sshfl [vmem:[#allocation1 + $0x8] sm:$0xff pattern:$0x75316420]  ;;  %v495_v37 = vsel %vm414_vm0, %v754_v33, %v494_v30 }
  0x31   : > { %v415_v4 = vsel %vm414_vm0, %v396_v2, -inf  ;;  %v422_v5 = vsel %vm414_vm0, %v397_v3, -inf  ;;  %v497_v39 = vadd.f32 %v495_v37, %v491_v36 }
  0x32   : > { %v416_v6 = vrot.slane %v415_v4, 4  ;;  %v423_v7 = vrot.slane %v422_v5, 4 }
  0x33   : > { %498 = vst [vmem:[#allocation5] sm:$0xff] %v497_v39 }
  0x34   : > { %v417_v8 = vmax.f32 %v415_v4, %v416_v6  ;;  %v424_v9 = vmax.f32 %v422_v5, %v423_v7 }
  0x36   : > { %v418_v10 = vrot.slane %v417_v8, 2  ;;  %v425_v11 = vrot.slane %v424_v9, 2 }
  0x38   : > { %v419_v12 = vmax.f32 %v417_v8, %v418_v10  ;;  %v426_v13 = vmax.f32 %v424_v9, %v425_v11  ;;  %v459_v9 = vld [vmem:[#allocation2] sm:$0xff] }
  0x3a   : > { %v420_v14 = vrot.slane %v419_v12, 1  ;;  %v427_v15 = vrot.slane %v426_v13, 1  ;;  %v544_v27 = vld [vmem:[#allocation5] sm:$0xff] (%p499_p0) }
  0x3c   : > { %v421_v16 = vmax.f32 %v419_v12, %v420_v14  ;;  %v428_v17 = vmax.f32 %v426_v13, %v427_v15 }
  0x3e   : > { %v429_v20 = vsub.f32 %v396_v2, %v421_v16  ;;  %v430_v21 = vsub.f32 %v397_v3, %v428_v17 }
  0x40   : > { %v431_v22 = vmul.f32 1.442695, %v429_v20  ;;  %v433_v23 = vmul.f32 1.442695, %v430_v21 }
  0x42   : > { %828 = vpow2.f32 %v431_v22 }
  0x43   : > { %830 = vpow2.f32 %v433_v23 }
  0x48   : > { %v829_v29 = vpop.eup %828 }
  0x49   : > { %v831_v31 = vpop.eup %830  ;;  %v435_v32 = vsel %vm414_vm0, %v829_v29, 0.0 }
  0x4a   : > { %v436_v34 = vrot.slane %v435_v32, 4  ;;  %v442_v35 = vsel %vm414_vm0, %v831_v31, 0.0 }
  0x4b   : > { %v443_v38 = vrot.slane %v442_v35, 4 }
  0x4c   : > { %v437_v40 = vadd.f32 %v436_v34, %v435_v32 }
  0x4d   : > { %v444_v41 = vadd.f32 %v443_v38, %v442_v35 }
  0x4e   : > { %v438_v42 = vrot.slane %v437_v40, 2 }
  0x4f   : > { %v445_v43 = vrot.slane %v444_v41, 2 }
  0x50   : > { %v439_v44 = vadd.f32 %v438_v42, %v437_v40 }
  0x51   : > { %v446_v45 = vadd.f32 %v445_v43, %v444_v41 }
  0x52   : > { %v440_v46 = vrot.slane %v439_v44, 1 }
  0x53   : > { %v447_v47 = vrot.slane %v446_v45, 1 }
  0x54   : > { %v441_v48 = vadd.f32 %v440_v46, %v439_v44 }
  0x55   : > { %v448_v49 = vadd.f32 %v447_v47, %v446_v45 }
  0x56   : > { %832 = vrcp.f32 %v441_v48 }
  0x57   : > { %834 = vrcp.f32 %v448_v49 }
  0x58   : > { %836 = vlog2.f32 %v441_v48 }
  0x59   : > { %838 = vlog2.f32 %v448_v49 }
  0x5c   : > { %v833_v50 = vpop.eup %832 }
  0x5d   : > { %v835_v51 = vpop.eup %834  ;;  %v457_v53 = vmul.f32 %v833_v50, %v829_v29 }
  0x5e   : > { %v837_v52 = vpop.eup %836  ;;  %v458_v54 = vmul.f32 %v835_v51, %v831_v31 }
  0x5f   : > { %v839_v55 = vpop.eup %838  ;;  %v450_v56 = vmul.f32 0.6931472, %v837_v52  ;;  %v472_v0 = vmul.f32 %v754_v33, %v457_v53 }
  0x60   : > { %v486_v58 = vrot.slane %v458_v54, 4  ;;  %v473_v59 = vmul.f32 %v755_v28, %v458_v54  ;;  %v452_v60 = vmul.f32 0.6931472, %v839_v55 }
  0x61   : > { %v453_v61 = vsub.f32 %v429_v20, %v450_v56 }
  0x62   : > { %v487_v62 = vsel %vm414_vm0, %v457_v53, %v486_v58  ;;  %v476_v1 = vrot.slane %v473_v59, 4  ;;  %v454_v2 = vsub.f32 %v430_v21, %v452_v60 }
  0x63   : > { %v489_v3 = vadd.f32 %v487_v62, %v481_v57  ;;  %v460_v5 = vsub.f32 0.0, %v453_v61 }
  0x64   : > { %v477_v4 = vsel %vm414_vm0, %v472_v0, %v476_v1  ;;  %v461_v6 = vsub.f32 0.0, %v454_v2 }
  0x65   : > { %490 = vst [vmem:[#allocation4] sm:$0xff] %v489_v3  ;;  %v479_v7 = vadd.f32 %v477_v4, %v471_v63  ;;  %v462_v10 = vmul.f32 %v754_v33, %v460_v5 }
  0x66   : > { %v463_v8 = vmul.f32 %v755_v28, %v461_v6 }
  0x67   : > { %480 = vst [vmem:[#allocation3] sm:$0xff] %v479_v7 }
  0x68   : > { %v466_v11 = vrot.slane %v463_v8, 4 }
  0x69   : > { %503 = sbr.rel (!%p499_p0) target bundleno = 269 (0x10d), region = 44 }
  0x6a   : > { %v467_v12 = vsel %vm414_vm0, %v462_v10, %v466_v11 }
  0x6b   : > { %v469_v13 = vadd.f32 %v467_v12, %v459_v9 }
  0x6c   : > { %v531_v21 = vld [vmem:[#allocation4] sm:$0xff] (%p499_p0) }
  0x6d   : > { %470 = vst [vmem:[#allocation2] sm:$0xff] %v469_v13 }
  0x6e   : > { %v518_v15 = vld [vmem:[#allocation3] sm:$0xff] }
  0x74   : > { %v504_v14 = vld [vmem:[#allocation2] sm:$0xff] }
  0x75   : > { %506 = vst [vmem:[#allocation1] ss:$2 sm:$0xff] %v504_v14 }
  0x7c   : > { %v507_v16 = vld.sshfl [vmem:[#allocation1] sm:$0xff pattern:$0x75316420]  ;;  %v508_v17 = vld.sshfl [vmem:[#allocation1 + $0x8] sm:$0xff pattern:$0x75316420] }
  0x7d   : > { %520 = vst [vmem:[#allocation1] ss:$2 sm:$0xff] %v518_v15  ;;  %v511_v18 = vsel %vm414_vm0, %v507_v16, 0.0  ;;  %v512_v19 = vsel %vm414_vm0, %v508_v17, 0.0 }
  0x7e   : > { %v513_v20 = vadd.f32 %v512_v19, %v511_v18 }
  0x80   : > { %514 = vadd.xlane.f32.xlu0 %v513_v20 }
  0x84   : > { %v521_v22 = vld.sshfl [vmem:[#allocation1] sm:$0xff pattern:$0x75316420]  ;;  %v522_v23 = vld.sshfl [vmem:[#allocation1 + $0x8] sm:$0xff pattern:$0x75316420] }
  0x85   : > { %533 = vst [vmem:[#allocation1] ss:$2 sm:$0xff] %v531_v21  ;;  %v525_v24 = vsel %vm414_vm0, %v521_v22, 0.0  ;;  %v526_v25 = vsel %vm414_vm0, %v522_v23, 0.0 }
  0x86   : > { %v527_v26 = vadd.f32 %v526_v25, %v525_v24 }
  0x88   : > { %528 = vadd.xlane.f32.xlu0 %v527_v26 }
  0x8c   : > { %v534_v28 = vld.sshfl [vmem:[#allocation1] sm:$0xff pattern:$0x75316420]  ;;  %v535_v29 = vld.sshfl [vmem:[#allocation1 + $0x8] sm:$0xff pattern:$0x75316420] }
  0x8d   : > { %v538_v30 = vsel %vm414_vm0, %v534_v28, 0.0  ;;  %v539_v31 = vsel %vm414_vm0, %v535_v29, 0.0  ;;  %546 = vst [vmem:[#allocation1] ss:$2 sm:$0xff] %v544_v27 }
  0x8e   : > { %v540_v32 = vadd.f32 %v539_v31, %v538_v30 }
  0x90   : > { %541 = vadd.xlane.f32.xlu1 %v540_v32 }
  0x94   : > { %v547_v33 = vld.sshfl [vmem:[#allocation1] sm:$0xff pattern:$0x75316420]  ;;  %v548_v34 = vld.sshfl [vmem:[#allocation1 + $0x8] sm:$0xff pattern:$0x75316420] }
  0x95   : > { %v551_v35 = vsel %vm414_vm0, %v547_v33, 0.0  ;;  %v552_v36 = vsel %vm414_vm0, %v548_v34, 0.0 }
  0x96   : > { %v553_v37 = vadd.f32 %v552_v36, %v551_v35 }
  0x98   : > { %554 = vadd.xlane.f32.xlu1 %v553_v37 }
  0xf3   : > { %v515_v38 = vpop.xlane.xlu0 %514 }
  0xf4   : > { %517 = vst.msk [vmem:[%s1124_s2] sm:$0xf] %vm516_vm3, %v515_v38 }
  0xfb   : > { %v529_v39 = vpop.xlane.xlu0 %528 }
  0xfc   : > { %530 = vst.msk [vmem:[%s1125_s3] sm:$0xf] %vm516_vm3, %v529_v39 }
 0x103   : > { %v542_v40 = vpop.xlane.xlu1 %541 }
 0x104   : > { %543 = vst.msk [vmem:[%s1126_s4] sm:$0xf] %vm516_vm3, %v542_v40 }
 0x10b   : > { %v555_v41 = vpop.xlane.xlu1 %554 }
 0x10c   : > { %556 = vst.msk [vmem:[%s1127_s5] sm:$0xf] %vm516_vm3, %v555_v41 }
 0x10d PF: > { %s22_s23 = sadd.s32 1, %s954_s23   ;;  %s1131_s18 = smov %s938_s19 }
 0x10e   : > { %p19_p1 = scmp.ge.s32.totalorder %s22_s23, 4   ;;  %s1132_s19 = smov %s942_s20 }
 0x10f   : > { %s1133_s20 = smov %s1037_s30  ;;  %s1134_s21 = smov %s950_s22 }
 0x110   : > { %s1135_s22 = smov %s1137_s25  ;;  %21 = sbr.rel (!%p19_p1) target bundleno = 6 (0x6), region = 125 }
 0x115   :  { %618 = vsyncpa [#allocation7], 1 }
 0x116   :  { %620 = vsyncpa [#allocation7 + $0x1], 1 }
 0x117   :  { %621 = vsyncpa [#allocation9], 1 }
 0x118   :  { %623 = vsyncpa [#allocation9 + $0x1], 1 }

</bundles_post_ra>
